<compile_context>
chip_gen: v7x
topology: tpu7x:2x2x1
jax: 0.10.0
libtpu: 0.0.40
codegen_flags: <defaults>
</compile_context>

<pallas_src>
import functools
import math

import numpy as np

import jax
import jax.numpy as jnp
from jax.experimental import pallas as pl
from jax.experimental.pallas import tpu as pltpu


# ---------------- deterministic "parameters" (Communication gaussian filter) ----
K_SIZE = 5
C_SIGMA = 1.0
THRESHOLD = 0.3          # args['communication']['threshold']
FULLY = False            # args['fully']
MULTI_SCALE = False      # args['multi_scale']  (backbone path not exercised)


# ---------------- cached separable Gaussian operators ---------------------------
@functools.lru_cache(maxsize=None)
def _gaussian_operators(H, W, k_size=K_SIZE, sigma=C_SIGMA):
    """1-D operators so that  smoothed = Ah @ conf @ Aw  exactly reproduces
    Conv2d(1,1,k, padding=k//2) with the (separable) Gaussian weight and zero
    bias from Communication.init_gaussian_filter."""
    center = k_size // 2
    d = np.arange(k_size) - center
    # full 2-D kernel = (1/(2*pi*sigma)) * exp(-(dx^2+dy^2)/(2*sigma^2))
    #                 = g1[dx] * g1[dy]   with the constant split evenly
    g1 = np.sqrt(1.0 / (2.0 * np.pi * sigma)) * np.exp(
        -np.square(d) / (2.0 * np.square(sigma)))
    g1 = g1.astype(np.float64)

    def right_op(n):
        # M[jj, j] = g1[jj - j + center]  (zero padding)  ->  row-conv = conf @ M
        M = np.zeros((n, n), np.float32)
        for j in range(n):
            for dd in range(k_size):
                jj = j + dd - center
                if 0 <= jj < n:
                    M[jj, j] += g1[dd]
        return M

    Aw = right_op(W)            # right operator (W axis)
    Ah = right_op(H).T          # left operator (H axis); symmetric anyway
    return jnp.asarray(Ah), jnp.asarray(Aw)


# ---------------- tiling helper --------------------------------------------------
def _pick_row_tile(H, W, C, L, itemsize, target_pixels=2048,
                   tile_budget_bytes=12 * 1024 * 1024):
    """Image rows per grid step. Block last-two dims are (TH, W): TH must be a
    multiple of 8 (or the full H) and must divide H evenly."""
    per_row = 2 * (L + 1) * C * W * max(itemsize, 4)   # double-buffered x tile + out tile
    rows_budget = max(1, tile_budget_bytes // max(per_row, 1))
    rows_target = max(1, target_pixels // max(W, 1))
    th = min(H, rows_budget, rows_target)
    if th >= H:
        return H
    th = max(8, (th // 8) * 8)
    while th > 8 and H % th:
        th -= 8
    return th if H % th == 0 else H


# ---------------- fused Pallas kernel --------------------------------------------
def make_fused_kernel(L, A, H, W, TH, C, threshold, fully):
    inv_lhw = 1.0 / float(L * H * W)
    scale = 1.0 / math.sqrt(C)

    def kernel(psm_ref, ah_ref, aw_ref, x_ref, o_ref, rate_ref, mask_sc):
        i = pl.program_id(0)

        # ---- grid step 0: communication mask (VMEM scratch) + rate (SMEM) ----
        @pl.when(i == 0)
        def _comm():
            if fully:
                rate_ref[0, 0] = jnp.float32(1.0)
            else:
                ah = ah_ref[...]
                aw = aw_ref[...]
                total = jnp.float32(0.0)
                for l in range(L):                       # L is static & small (CAV count)
                    conf_l = jnp.max(                     # sigmoid -> max over anchors
                        jax.nn.sigmoid(psm_ref[l].astype(jnp.float32)), axis=0)   # (H, W)
                    # separable Gaussian smoothing: Ah @ conf @ Aw
                    sm_l = jnp.dot(
                        ah,
                        jnp.dot(conf_l, aw, preferred_element_type=jnp.float32),
                        preferred_element_type=jnp.float32)
                    m_l = jnp.where(sm_l > threshold, 1.0, 0.0).astype(jnp.float32)
                    total = total + jnp.sum(m_l)          # rate BEFORE forcing ego row
                    mask_sc[l] = jnp.ones_like(m_l) if l == 0 else m_l   # mask[0] = 1
                rate_ref[0, 0] = total * inv_lhw

        # ---- every step: per-pixel attention over the L agents (ego output) ----
        x = x_ref[...].astype(jnp.float32)                # (L, C, TH, W)
        if fully:
            xm = x
        else:
            off = pl.multiple_of(i * TH, TH)
            m = mask_sc[:, pl.ds(off, TH), :]             # (L, TH, W)
            xm = x * m[:, None, :, :]                     # x * communication_mask
        q = xm[0]                                         # ego query (C, TH, W)
        # scores: reduce over C, a leading dim -> pure VPU adds (no XLU reduce)
        s = jnp.sum(q[None] * xm, axis=1) * scale         # (L, TH, W)
        s = s - jnp.max(s, axis=0, keepdims=True)
        e = jnp.exp(s)
        a = e * pl.reciprocal(jnp.sum(e, axis=0, keepdims=True), approx=True)
        o = jnp.sum(a[:, None, :, :] * xm, axis=0)        # attn @ V -> (C, TH, W)
        o_ref[...] = o.astype(o_ref.dtype)

    return kernel


# ---------------- per-batch wrapper ----------------------------------------------
def _fused_where2comm_call(psm_b, ah, aw, x_b, *, threshold, fully, out_dtype,
                           target_pixels=2048):
    """psm_b: (L, A, H, W), x_b: (L, C, H, W) -> (fused ego feature (C, H, W), rate)."""
    L, C, H, W = x_b.shape
    A = psm_b.shape[1]
    itemsize = jnp.dtype(x_b.dtype).itemsize
    TH = _pick_row_tile(H, W, C, L, itemsize, target_pixels)
    grid = (H // TH,)

    # VMEM estimate: resident inputs + mask scratch + double-buffered x/out tiles.
    est = (psm_b.size * jnp.dtype(psm_b.dtype).itemsize
           + (H * H + W * W + L * H * W) * 4
           + 2 * L * C * TH * W * itemsize
           + 2 * C * TH * W * jnp.dtype(out_dtype).itemsize)
    vmem_limit = None
    if est > (24 << 20):
        vmem_limit = int(min(est * 5 // 4 + (4 << 20), 96 << 20))

    kernel = make_fused_kernel(L, A, H, W, TH, C, threshold, fully)
    fused, rate = pl.pallas_call(
        kernel,
        grid=grid,
        in_specs=[
            pl.BlockSpec((L, A, H, W), lambda i: (0, 0, 0, 0)),   # psm: resident
            pl.BlockSpec((H, H), lambda i: (0, 0)),               # Ah:  resident
            pl.BlockSpec((W, W), lambda i: (0, 0)),               # Aw:  resident
            pl.BlockSpec((L, C, TH, W), lambda i: (0, 0, i, 0)),  # x:   row tiles
        ],
        out_specs=[
            pl.BlockSpec((C, TH, W), lambda i: (0, i, 0)),        # fused ego feature
            pl.BlockSpec(memory_space=pltpu.SMEM),                # scalar comm rate
        ],
        out_shape=[
            jax.ShapeDtypeStruct((C, H, W), out_dtype),
            jax.ShapeDtypeStruct((1, 1), jnp.float32),
        ],
        scratch_shapes=[pltpu.VMEM((L, H, W), jnp.float32)],      # mask stays on-chip
        compiler_params=pltpu.CompilerParams(
            dimension_semantics=("arbitrary",),   # mask scratch carried across tiles
            vmem_limit_bytes=vmem_limit),
    )(psm_b, ah, aw, x_b)
    return fused, rate[0, 0]


# ---------------- module forward --------------------------------------------------
def where2comm_forward(x, psm_single, record_len, pairwise_t_matrix,
                       threshold=THRESHOLD, fully=FULLY,
                       use_bf16_dma=False, target_pixels=2048):
    """x: (sum(n_cav), C, H, W), psm_single: (sum(n_cav), A, H, W),
    record_len: python list of ints, pairwise_t_matrix: (B, L, L, 4, 4)."""
    N, C, H, W = x.shape
    B = pairwise_t_matrix.shape[0]
    ah, aw = _gaussian_operators(H, W)

    offsets = np.cumsum([0] + list(record_len))
    fused, rates = [], []
    for b in range(B):
        s, e = int(offsets[b]), int(offsets[b + 1])
        x_b = x[s:e]
        psm_b = psm_single[s:e]
        if use_bf16_dma:
            # halves HBM->VMEM traffic of the memory-bound attention; compute
            # stays f32 inside the kernel (off by default for exactness).
            x_in = x_b.astype(jnp.bfloat16)
            psm_in = psm_b.astype(jnp.bfloat16)
        else:
            x_in, psm_in = x_b, psm_b
        fused_b, rate_b = _fused_where2comm_call(
            psm_in, ah, aw, x_in,
            threshold=threshold, fully=fully, out_dtype=x.dtype,
            target_pixels=target_pixels)
        fused.append(fused_b)
        rates.append(rate_b)
    x_fuse = jnp.stack(fused)                                   # (B, C, H, W)
    if fully:
        communication_rates = jnp.float32(1.0)
    else:
        communication_rates = sum(rates) / B
    # TODO(synk): training-mode random top-k mask (torch.topk + scatter with a
    #             Python-random K) is not translated (eval path only).
    # TODO(synk): multi_scale backbone/deblock path is not translated.
    # TODO(synk): cross-batch fusion via PrefetchScalarGridSpec (pad L to Lmax,
    #             prefetch record_len offsets) left as a follow-up; the per-batch
    #             loop keeps ragged L exact with one fused launch per sample.
    return x_fuse, communication_rates


# ---------------- demo -------------------------------------------------------------
if __name__ == "__main__":
    key = jax.random.PRNGKey(0)
    k1, k2 = jax.random.split(key)

    B = 2
    record_len = [2, 2]            # CAVs per batch sample
    N = sum(record_len)
    C, A, H, W = 4, 2, 16, 16
    Lmax = max(record_len)

    x = jax.random.normal(k1, (N, C, H, W), jnp.float32)
    psm_single = jax.random.normal(k2, (N, A, H, W), jnp.float32)
    pairwise_t_matrix = jnp.tile(jnp.eye(4, dtype=jnp.float32),
                                 (B, Lmax, Lmax, 1, 1))

    x_fuse, comm_rate = where2comm_forward(x, psm_single, record_len,
                                           pairwise_t_matrix)
    jax.block_until_ready(x_fuse)
    jax.block_until_ready(comm_rate)
    assert x_fuse.shape == (B, C, H, W)
    assert x_fuse.dtype == x.dtype
    assert bool(jnp.all(jnp.isfinite(x_fuse)))
    assert bool(jnp.isfinite(comm_rate))
    print("KERNEL_OK")
</pallas_src>

<mosaic_0001>
module attributes {stable_mosaic.version = 11 : i64} {
  func.func @kernel(%arg0: i32, %arg1: memref<2x2x16x16xf32, #tpu.memory_space<vmem>>, %arg2: memref<16x16xf32, #tpu.memory_space<vmem>>, %arg3: memref<16x16xf32, #tpu.memory_space<vmem>>, %arg4: memref<2x4x16x16xf32, #tpu.memory_space<vmem>>, %arg5: memref<4x16x16xf32, #tpu.memory_space<vmem>>, %arg6: memref<1x1xf32, #tpu.memory_space<smem>>, %arg7: memref<2x16x16xf32, #tpu.memory_space<vmem>>) attributes {dimension_semantics = [#tpu.dimension_semantics<arbitrary>], iteration_bounds = array<i64: 1>, scalar_prefetch = 0 : i64, scratch_operands = 1 : i64, tpu.core_type = #tpu.core_type<tc>, window_params = [{pipeline_mode = #tpu.pipeline_mode<synchronous>, transform_indices = @transform_0, window_bounds = array<i64: 2, 2, 16, 16>}, {pipeline_mode = #tpu.pipeline_mode<synchronous>, transform_indices = @transform_1, window_bounds = array<i64: 16, 16>}, {pipeline_mode = #tpu.pipeline_mode<synchronous>, transform_indices = @transform_2, window_bounds = array<i64: 16, 16>}, {transform_indices = @transform_3, window_bounds = array<i64: 2, 4, 16, 16>}, {transform_indices = @transform_4, window_bounds = array<i64: 4, 16, 16>}, {transform_indices = @transform_5, window_bounds = array<i64: 1, 1>}]} {
    %c0_i32 = arith.constant 0 : i32
    %0 = arith.cmpi eq, %arg0, %c0_i32 : i32
    %1 = arith.extui %0 : i1 to i32
    %c0_i32_0 = arith.constant 0 : i32
    %2 = arith.cmpi ne, %1, %c0_i32_0 : i32
    scf.if %2 {
      %c0_13 = arith.constant 0 : index
      %c0_14 = arith.constant 0 : index
      %34 = vector.load %arg2[%c0_13, %c0_14] : memref<16x16xf32, #tpu.memory_space<vmem>>, vector<16x16xf32>
      %c0_15 = arith.constant 0 : index
      %c0_16 = arith.constant 0 : index
      %35 = vector.load %arg3[%c0_15, %c0_16] : memref<16x16xf32, #tpu.memory_space<vmem>>, vector<16x16xf32>
      %c0_17 = arith.constant 0 : index
      %c0_18 = arith.constant 0 : index
      %c0_19 = arith.constant 0 : index
      %c0_20 = arith.constant 0 : index
      %36 = vector.load %arg1[%c0_17, %c0_18, %c0_19, %c0_20] : memref<2x2x16x16xf32, #tpu.memory_space<vmem>>, vector<1x2x16x16xf32>
      %37 = vector.shape_cast %36 : vector<1x2x16x16xf32> to vector<2x16x16xf32>
      %38 = arith.negf %37 : vector<2x16x16xf32>
      %39 = math.exp %38 : vector<2x16x16xf32>
      %cst_21 = arith.constant 1.000000e+00 : f32
      %40 = vector.broadcast %cst_21 : f32 to vector<2x16x16xf32>
      %41 = arith.addf %40, %39 : vector<2x16x16xf32>
      %42 = arith.divf %40, %41 : vector<2x16x16xf32>
      %cst_22 = arith.constant dense<0xFF800000> : vector<16x16xf32>
      %43 = vector.multi_reduction <maximumf>, %42, %cst_22 [0] : vector<2x16x16xf32> to vector<16x16xf32>
      %cst_23 = arith.constant dense<0.000000e+00> : vector<16x16xf32>
      %44 = tpu.matmul %43, %35, %cst_23 {dimension_numbers = #tpu.dot_dimension_numbers<[1], [0], [0], [1], [0, 0, 1, 1], [], []>} : vector<16x16xf32>, vector<16x16xf32>, vector<16x16xf32> -> vector<16x16xf32>
      %cst_24 = arith.constant dense<0.000000e+00> : vector<16x16xf32>
      %45 = tpu.matmul %34, %44, %cst_24 {dimension_numbers = #tpu.dot_dimension_numbers<[1], [0], [0], [1], [0, 0, 1, 1], [], []>} : vector<16x16xf32>, vector<16x16xf32>, vector<16x16xf32> -> vector<16x16xf32>
      %cst_25 = arith.constant 3.000000e-01 : f32
      %46 = vector.broadcast %cst_25 : f32 to vector<16x16xf32>
      %47 = arith.cmpf ogt, %45, %46 : vector<16x16xf32>
      %cst_26 = arith.constant 1.000000e+00 : f32
      %cst_27 = arith.constant 0.000000e+00 : f32
      %48 = vector.broadcast %cst_26 : f32 to vector<16x16xf32>
      %49 = vector.broadcast %cst_27 : f32 to vector<16x16xf32>
      %50 = arith.select %47, %48, %49 : vector<16x16xi1>, vector<16x16xf32>
      %51 = vector.shape_cast %50 : vector<16x16xf32> to vector<1x16x16xf32>
      %cst_28 = arith.constant dense<0.000000e+00> : vector<1xf32>
      %52 = vector.multi_reduction <add>, %51, %cst_28 [1, 2] : vector<1x16x16xf32> to vector<1xf32>
      %53 = vector.shape_cast %52 : vector<1xf32> to vector<1x1x1xf32>
      %54 = vector.extract %53[0, 0, 0] : f32 from vector<1x1x1xf32>
      %cst_29 = arith.constant 0.000000e+00 : f32
      %55 = arith.addf %cst_29, %54 : f32
      %cst_30 = arith.constant 1.000000e+00 : f32
      %56 = vector.broadcast %cst_30 : f32 to vector<16x16xf32>
      %c0_31 = arith.constant 0 : index
      %c0_32 = arith.constant 0 : index
      %c0_33 = arith.constant 0 : index
      %57 = vector.load %arg7[%c0_31, %c0_32, %c0_33] : memref<2x16x16xf32, #tpu.memory_space<vmem>>, vector<1x16x16xf32>
      %58 = vector.shape_cast %57 : vector<1x16x16xf32> to vector<16x16xf32>
      %59 = vector.shape_cast %56 : vector<16x16xf32> to vector<1x16x16xf32>
      tpu.vector_store %arg7[%c0_31, %c0_32, %c0_33], %59 {strides = array<i32>} : memref<2x16x16xf32, #tpu.memory_space<vmem>>, vector<1x16x16xf32>,
      %c1 = arith.constant 1 : index
      %c0_34 = arith.constant 0 : index
      %c0_35 = arith.constant 0 : index
      %c0_36 = arith.constant 0 : index
      %60 = vector.load %arg1[%c1, %c0_34, %c0_35, %c0_36] : memref<2x2x16x16xf32, #tpu.memory_space<vmem>>, vector<1x2x16x16xf32>
      %61 = vector.shape_cast %60 : vector<1x2x16x16xf32> to vector<2x16x16xf32>
      %62 = arith.negf %61 : vector<2x16x16xf32>
      %63 = math.exp %62 : vector<2x16x16xf32>
      %cst_37 = arith.constant 1.000000e+00 : f32
      %64 = vector.broadcast %cst_37 : f32 to vector<2x16x16xf32>
      %65 = arith.addf %64, %63 : vector<2x16x16xf32>
      %66 = arith.divf %64, %65 : vector<2x16x16xf32>
      %cst_38 = arith.constant dense<0xFF800000> : vector<16x16xf32>
      %67 = vector.multi_reduction <maximumf>, %66, %cst_38 [0] : vector<2x16x16xf32> to vector<16x16xf32>
      %cst_39 = arith.constant dense<0.000000e+00> : vector<16x16xf32>
      %68 = tpu.matmul %67, %35, %cst_39 {dimension_numbers = #tpu.dot_dimension_numbers<[1], [0], [0], [1], [0, 0, 1, 1], [], []>} : vector<16x16xf32>, vector<16x16xf32>, vector<16x16xf32> -> vector<16x16xf32>
      %cst_40 = arith.constant dense<0.000000e+00> : vector<16x16xf32>
      %69 = tpu.matmul %34, %68, %cst_40 {dimension_numbers = #tpu.dot_dimension_numbers<[1], [0], [0], [1], [0, 0, 1, 1], [], []>} : vector<16x16xf32>, vector<16x16xf32>, vector<16x16xf32> -> vector<16x16xf32>
      %cst_41 = arith.constant 3.000000e-01 : f32
      %70 = vector.broadcast %cst_41 : f32 to vector<16x16xf32>
      %71 = arith.cmpf ogt, %69, %70 : vector<16x16xf32>
      %cst_42 = arith.constant 1.000000e+00 : f32
      %cst_43 = arith.constant 0.000000e+00 : f32
      %72 = vector.broadcast %cst_42 : f32 to vector<16x16xf32>
      %73 = vector.broadcast %cst_43 : f32 to vector<16x16xf32>
      %74 = arith.select %71, %72, %73 : vector<16x16xi1>, vector<16x16xf32>
      %75 = vector.shape_cast %74 : vector<16x16xf32> to vector<1x16x16xf32>
      %cst_44 = arith.constant dense<0.000000e+00> : vector<1xf32>
      %76 = vector.multi_reduction <add>, %75, %cst_44 [1, 2] : vector<1x16x16xf32> to vector<1xf32>
      %77 = vector.shape_cast %76 : vector<1xf32> to vector<1x1x1xf32>
      %78 = vector.extract %77[0, 0, 0] : f32 from vector<1x1x1xf32>
      %79 = arith.addf %55, %78 : f32
      %c1_45 = arith.constant 1 : index
      %c0_46 = arith.constant 0 : index
      %c0_47 = arith.constant 0 : index
      %80 = vector.load %arg7[%c1_45, %c0_46, %c0_47] : memref<2x16x16xf32, #tpu.memory_space<vmem>>, vector<1x16x16xf32>
      %81 = vector.shape_cast %80 : vector<1x16x16xf32> to vector<16x16xf32>
      %82 = vector.shape_cast %74 : vector<16x16xf32> to vector<1x16x16xf32>
      tpu.vector_store %arg7[%c1_45, %c0_46, %c0_47], %82 {strides = array<i32>} : memref<2x16x16xf32, #tpu.memory_space<vmem>>, vector<1x16x16xf32>,
      %cst_48 = arith.constant 0.001953125 : f32
      %83 = arith.mulf %79, %cst_48 : f32
      %c0_49 = arith.constant 0 : index
      %c0_50 = arith.constant 0 : index
      %84 = memref.load %arg6[%c0_49, %c0_50] : memref<1x1xf32, #tpu.memory_space<smem>>
      memref.store %83, %arg6[%c0_49, %c0_50] : memref<1x1xf32, #tpu.memory_space<smem>>
    } else {
    }
    %c0 = arith.constant 0 : index
    %c0_1 = arith.constant 0 : index
    %c0_2 = arith.constant 0 : index
    %c0_3 = arith.constant 0 : index
    %3 = vector.load %arg4[%c0, %c0_1, %c0_2, %c0_3] : memref<2x4x16x16xf32, #tpu.memory_space<vmem>>, vector<2x4x16x16xf32>
    %c16_i32 = arith.constant 16 : i32
    %4 = arith.muli %arg0, %c16_i32 : i32
    %5 = tpu.assume_multiple %4, 16 : i32
    %c0_4 = arith.constant 0 : index
    %6 = arith.index_cast %5 : i32 to index
    %c0_5 = arith.constant 0 : index
    %7 = vector.load %arg7[%c0_4, %6, %c0_5] : memref<2x16x16xf32, #tpu.memory_space<vmem>>, vector<2x16x16xf32>
    %8 = vector.shape_cast %7 : vector<2x16x16xf32> to vector<2x1x16x16xf32>
    %9 = vector.broadcast %8 : vector<2x1x16x16xf32> to vector<2x4x16x16xf32>
    %10 = arith.mulf %3, %9 : vector<2x4x16x16xf32>
    %11 = vector.extract_strided_slice %10 {offsets = [0, 0, 0, 0], sizes = [1, 4, 16, 16], strides = [1, 1, 1, 1]} : vector<2x4x16x16xf32> to vector<1x4x16x16xf32>
    %12 = vector.shape_cast %11 : vector<1x4x16x16xf32> to vector<4x16x16xf32>
    %13 = vector.shape_cast %12 : vector<4x16x16xf32> to vector<1x4x16x16xf32>
    %14 = vector.broadcast %13 : vector<1x4x16x16xf32> to vector<2x4x16x16xf32>
    %15 = arith.mulf %14, %10 : vector<2x4x16x16xf32>
    %cst = arith.constant dense<0.000000e+00> : vector<2x16x16xf32>
    %16 = vector.multi_reduction <add>, %15, %cst [1] : vector<2x4x16x16xf32> to vector<2x16x16xf32>
    %cst_6 = arith.constant 5.000000e-01 : f32
    %17 = vector.broadcast %cst_6 : f32 to vector<2x16x16xf32>
    %18 = arith.mulf %16, %17 : vector<2x16x16xf32>
    %cst_7 = arith.constant dense<0xFF800000> : vector<16x16xf32>
    %19 = vector.multi_reduction <maximumf>, %18, %cst_7 [0] : vector<2x16x16xf32> to vector<16x16xf32>
    %20 = vector.shape_cast %19 : vector<16x16xf32> to vector<1x16x16xf32>
    %21 = vector.broadcast %20 : vector<1x16x16xf32> to vector<2x16x16xf32>
    %22 = arith.subf %18, %21 : vector<2x16x16xf32>
    %23 = math.exp %22 : vector<2x16x16xf32>
    %cst_8 = arith.constant dense<0.000000e+00> : vector<16x16xf32>
    %24 = vector.multi_reduction <add>, %23, %cst_8 [0] : vector<2x16x16xf32> to vector<16x16xf32>
    %25 = vector.shape_cast %24 : vector<16x16xf32> to vector<1x16x16xf32>
    %26 = tpu.reciprocal %25 {approx = true} : vector<1x16x16xf32> -> vector<1x16x16xf32>
    %27 = vector.broadcast %26 : vector<1x16x16xf32> to vector<2x16x16xf32>
    %28 = arith.mulf %23, %27 : vector<2x16x16xf32>
    %29 = vector.shape_cast %28 : vector<2x16x16xf32> to vector<2x1x16x16xf32>
    %30 = vector.broadcast %29 : vector<2x1x16x16xf32> to vector<2x4x16x16xf32>
    %31 = arith.mulf %30, %10 : vector<2x4x16x16xf32>
    %cst_9 = arith.constant dense<0.000000e+00> : vector<4x16x16xf32>
    %32 = vector.multi_reduction <add>, %31, %cst_9 [0] : vector<2x4x16x16xf32> to vector<4x16x16xf32>
    %c0_10 = arith.constant 0 : index
    %c0_11 = arith.constant 0 : index
    %c0_12 = arith.constant 0 : index
    %33 = vector.load %arg5[%c0_10, %c0_11, %c0_12] : memref<4x16x16xf32, #tpu.memory_space<vmem>>, vector<4x16x16xf32>
    tpu.vector_store %arg5[%c0_10, %c0_11, %c0_12], %32 {strides = array<i32>} : memref<4x16x16xf32, #tpu.memory_space<vmem>>, vector<4x16x16xf32>,
    return
  }
  func.func @transform_0(%arg0: i32) -> (i32, i32, i32, i32) {
    %c0_i32 = arith.constant 0 : i32
    %c0_i32_0 = arith.constant 0 : i32
    %c0_i32_1 = arith.constant 0 : i32
    %c0_i32_2 = arith.constant 0 : i32
    %c0_i32_3 = arith.constant 0 : i32
    return %c0_i32, %c0_i32_0, %c0_i32_1, %c0_i32_2 : i32, i32, i32, i32
  }
  func.func @transform_1(%arg0: i32) -> (i32, i32) {
    %c0_i32 = arith.constant 0 : i32
    %c0_i32_0 = arith.constant 0 : i32
    %c0_i32_1 = arith.constant 0 : i32
    return %c0_i32, %c0_i32_0 : i32, i32
  }
  func.func @transform_2(%arg0: i32) -> (i32, i32) {
    %c0_i32 = arith.constant 0 : i32
    %c0_i32_0 = arith.constant 0 : i32
    %c0_i32_1 = arith.constant 0 : i32
    return %c0_i32, %c0_i32_0 : i32, i32
  }
  func.func @transform_3(%arg0: i32) -> (i32, i32, i32, i32) {
    %c0_i32 = arith.constant 0 : i32
    %c0_i32_0 = arith.constant 0 : i32
    %c0_i32_1 = arith.constant 0 : i32
    %c0_i32_2 = arith.constant 0 : i32
    return %c0_i32, %c0_i32_0, %arg0, %c0_i32_1 : i32, i32, i32, i32
  }
  func.func @transform_4(%arg0: i32) -> (i32, i32, i32) {
    %c0_i32 = arith.constant 0 : i32
    %c0_i32_0 = arith.constant 0 : i32
    %c0_i32_1 = arith.constant 0 : i32
    return %c0_i32, %arg0, %c0_i32_0 : i32, i32, i32
  }
  func.func @transform_5(%arg0: i32) -> (i32, i32) {
    %c0_i32 = arith.constant 0 : i32
    %c0_i32_0 = arith.constant 0 : i32
    %c0_i32_1 = arith.constant 0 : i32
    return %c0_i32, %c0_i32_0 : i32, i32
  }
}

</mosaic_0001>

<bundles_post_ra>
// kernel: tpu_custom_call.1
= control target key start
LH: loop header
LB: loop body
LE: loop exit
PB: predicated region body
PF: predicated region fallthrough
CT: control target
= control target key end

     0   :  { %11 = vsyncpa [#allocation4], 0  ;;  %s1274_s0 = inlined_call_operand.hbm [shape: f32[2,2,16,16], index: 0, kind: input, shape index: {}]   ;;  %s1275_s1 = inlined_call_operand.hbm [shape: f32[16,16], index: 1, kind: input, shape index: {}]   ;;  %s1276_s2 = inlined_call_operand.hbm [shape: f32[16,16], index: 2, kind: input, shape index: {}]   ;;  %s1277_s3 = inlined_call_operand.hbm [shape: f32[2,4,16,16], index: 3, kind: input, shape index: {}]   ;;  %s1278_s4 = inlined_call_operand.hbm [shape: f32[4,16,16], index: 4, kind: output, shape index: {0}]   ;;  %s1279_s5 = inlined_call_operand.hbm [shape: f32[1,1], index: 5, kind: output, shape index: {1}]  }
   0x1   :  { %12 = vsyncpa [#allocation8], 0 }
   0x2   :  { %13 = vsyncpa [#allocation11], 0 }
   0x3   :  { %14 = vsyncpa [#allocation5], 0 }
   0x4   :  { %15 = vsyncpa [#allocation6], 0  ;;  %s975_s18 = smov [#allocation7]   ;;  %s976_s20 = smov [#allocation3]  }
   0x5   :  { %s33_s19 = sshll.u32 %s975_s18, 4  ;;  %s21_s21 = sshll.u32 %s976_s20, 4  ;;  %s34_s19 = int_to_ptr.vmem [resolvable:$true] %s33_s19  ;;  %s1015_s21 = int_to_ptr.vmem [resolvable:$true] %s21_s21 }
   0x6   :  { %s845_s24 = scalar_lea.hbm %s1275_s1, 256 }
   0x7   :  { %p846_p0 = scmp.ne.s32.totalorder %s1275_s1, %s845_s24  ;;  %p849_p1 = scmp.lt.u32.totalorder %s845_s24, %s1275_s1 }
   0x9   :  { %p851_p2 = pnand %p849_p1, %p846_p0 }
   0xb   :  { %854 = shalt.err (!%p851_p2)
}
   0xc   :  { %s855_s29 = scalar_lea.vmem %s34_s19, 256  ;;  %p860_p4 = scmp.lt.s32.totalorder %s34_s19, %s34_s19 }
   0xd   :  { %p856_p3 = scmp.ne.s32.totalorder %s34_s19, %s855_s29  ;;  %p861_p5 = scmp.lt.s32.totalorder %s855_s29, %s855_s29 }
   0xf   :  { %p862_p6 = por %p861_p5, %p860_p4 }
  0x11   :  { %p863_p7 = pnand %p862_p6, %p856_p3 }
  0x13   :  { %866 = shalt.err (!%p863_p7)
}
  0x14   :  { %s977_s30 = smov 128   ;;  %s978_s6 = smov 8  }
  0x15   :  { %39 = dma.hbm_to_vmem [thread:$0]  %s1275_s1, 256, %s34_s19, [#allocation8], %s977_s30, %s977_s30, %s978_s6  }
  0x16   :  { %s867_s11 = scalar_lea.hbm %s1274_s0, 1024 }
  0x17   :  { %p868_p8 = scmp.ne.s32.totalorder %s1274_s0, %s867_s11  ;;  %p871_p9 = scmp.lt.u32.totalorder %s867_s11, %s1274_s0 }
  0x19   :  { %p873_p10 = pnand %p871_p9, %p868_p8 }
  0x1b   :  { %876 = shalt.err (!%p873_p10)
}
  0x1c   :  { %s877_s16 = scalar_lea.vmem %s1015_s21, 1024  ;;  %p882_p12 = scmp.lt.s32.totalorder %s1015_s21, %s1015_s21 }
  0x1d   :  { %p878_p11 = scmp.ne.s32.totalorder %s1015_s21, %s877_s16  ;;  %p883_p13 = scmp.lt.s32.totalorder %s877_s16, %s877_s16 }
  0x1f   :  { %p884_p0 = por %p883_p13, %p882_p12 }
  0x21   :  { %p885_p1 = pnand %p884_p0, %p878_p11 }
  0x23   :  { %888 = shalt.err (!%p885_p1)
}
  0x24   :  { %27 = dma.hbm_to_vmem [thread:$0]  %s1274_s0, 1024, %s1015_s21, [#allocation4], %s977_s30, %s977_s30, %s978_s6  }
  0x25   :  { %s979_s18 = smov [#allocation9]   ;;  %s980_s20 = smov [#allocation10]  }
  0x26   :  { %s45_s19 = sshll.u32 %s979_s18, 4  ;;  %s57_s22 = sshll.u32 %s980_s20, 4  ;;  %s46_s19 = int_to_ptr.vmem [resolvable:$true] %s45_s19  ;;  %s1052_s22 = int_to_ptr.vmem [resolvable:$true] %s57_s22 }
  0x27   :  { %s889_s25 = scalar_lea.hbm %s1276_s2, 256 }
  0x28   :  { %p890_p2 = scmp.ne.s32.totalorder %s1276_s2, %s889_s25  ;;  %p893_p3 = scmp.lt.u32.totalorder %s889_s25, %s1276_s2 }
  0x2a   :  { %p895_p4 = pnand %p893_p3, %p890_p2 }
  0x2c   :  { %898 = shalt.err (!%p895_p4)
}
  0x2d   :  { %s899_s0 = scalar_lea.vmem %s46_s19, 256  ;;  %p904_p6 = scmp.lt.s32.totalorder %s46_s19, %s46_s19 }
  0x2e   :  { %p900_p5 = scmp.ne.s32.totalorder %s46_s19, %s899_s0  ;;  %p905_p7 = scmp.lt.s32.totalorder %s899_s0, %s899_s0 }
  0x30   :  { %p906_p8 = por %p905_p7, %p904_p6 }
  0x32   :  { %p907_p9 = pnand %p906_p8, %p900_p5 }
  0x34   :  { %910 = shalt.err (!%p907_p9)
}
  0x35   :  { %51 = dma.hbm_to_vmem [thread:$0]  %s1276_s2, 256, %s46_s19, [#allocation8], %s977_s30, %s977_s30, %s978_s6  }
  0x36   :  { %s911_s10 = scalar_lea.hbm %s1277_s3, 2048 }
  0x37   :  { %p912_p10 = scmp.ne.s32.totalorder %s1277_s3, %s911_s10  ;;  %p915_p11 = scmp.lt.u32.totalorder %s911_s10, %s1277_s3 }
  0x39   :  { %p917_p12 = pnand %p915_p11, %p912_p10 }
  0x3b   :  { %920 = shalt.err (!%p917_p12)
}
  0x3c   :  { %s921_s15 = scalar_lea.vmem %s1052_s22, 2048  ;;  %p926_p0 = scmp.lt.s32.totalorder %s1052_s22, %s1052_s22 }
  0x3d   :  { %p922_p13 = scmp.ne.s32.totalorder %s1052_s22, %s921_s15  ;;  %p927_p1 = scmp.lt.s32.totalorder %s921_s15, %s921_s15 }
  0x3f   :  { %p928_p2 = por %p927_p1, %p926_p0 }
  0x41   :  { %p929_p3 = pnand %p928_p2, %p922_p13 }
  0x43   :  { %932 = shalt.err (!%p929_p3)
}
  0x44   :  { %63 = dma.hbm_to_vmem [thread:$0]  %s1277_s3, 2048, %s1052_s22, [#allocation11], %s977_s30, %s977_s30, %s978_s6  }
  0x45   :  { %965 = dma.done.wait [#allocation4], 1024  }
  0x46   :  { %966 = vsyncadd [#allocation4], 4294966272 }
  0x47   :  { %967 = dma.done.wait [#allocation8], 512  }
  0x48   :  { %968 = vsyncadd [#allocation8], 4294966784 }
  0x49   :  { %969 = dma.done.wait [#allocation11], 2048  }
  0x4a   :  { %970 = vsyncadd [#allocation11], 4294965248  ;;  %v82_v0 = vld [vmem:[#allocation9] sm:$0xff]  ;;  %v83_v1 = vld [vmem:[#allocation9 + $0x8] sm:$0xff]  ;;  %vm112_vm0 = vcmask 130048   ;;  %v981_v63 = vmov 1.0  }
  0x4b   :  { %v84_v2 = vld [vmem:[#allocation3] sm:$0xff]  ;;  %v1089_v3 = vpack.c.bf16 %v83_v1, %v82_v0  ;;  %v86_v4 = vld [vmem:[#allocation3 + $0x10] sm:$0xff]  ;;  %v85_v6 = vld [vmem:[#allocation3 + $0x8] sm:$0xff]  ;;  %298 = vst.msk [vmem:[#allocation2] sm:$0xff] %vm112_vm0, %v981_v63  ;;  %s983_s3 = smov [#allocation12]  }
  0x4c   :  { %v711_v5 = vmul.f32 -1.442695, %v84_v2  ;;  %v87_v7 = vld [vmem:[#allocation3 + $0x18] sm:$0xff]  ;;  %v713_v8 = vmul.f32 -1.442695, %v86_v4  ;;  %v301_v11 = vld [vmem:[#allocation3 + $0x20] sm:$0xff] }
  0x4d   :  { %v712_v9 = vmul.f32 -1.442695, %v85_v6  ;;  %v714_v10 = vmul.f32 -1.442695, %v87_v7  ;;  %772 = vmatprep.subr.bf16.mxu0 %v1089_v3  ;;  %v303_v12 = vld [vmem:[#allocation3 + $0x30] sm:$0xff]  ;;  %v302_v13 = vld [vmem:[#allocation3 + $0x28] sm:$0xff] }
  0x4e   :  { %801 = vpow2.f32 %v711_v5  ;;  %774 = vmatpush3.bf16.msra.mxu0 %v1089_v3  ;;  %v719_v14 = vmul.f32 -1.442695, %v301_v11  ;;  %v721_v15 = vmul.f32 -1.442695, %v303_v12  ;;  %v304_v16 = vld [vmem:[#allocation3 + $0x38] sm:$0xff]  ;;  %v80_v55 = vld [vmem:[#allocation7] sm:$0xff] }
  0x4f   :  { %803 = vpow2.f32 %v713_v8  ;;  %780 = vmatprep.subr.bf16.mxu0 %v1089_v3  ;;  %v720_v17 = vmul.f32 -1.442695, %v302_v13  ;;  %v722_v18 = vmul.f32 -1.442695, %v304_v16  ;;  %754 = vmatprep.mubr.msk.f32.mxu1 %vm112_vm0, %v80_v55  ;;  %v81_v61 = vld [vmem:[#allocation7 + $0x8] sm:$0xff]  ;;  %299 = vst.msk [vmem:[#allocation2 + $0x8] sm:$0xff] %vm112_vm0, %v981_v63 }
  0x50   :  { %805 = vpow2.f32 %v712_v9  ;;  %v514_v0 = vld [vmem:[#allocation10] sm:$0xff]  ;;  %v516_v1 = vld [vmem:[#allocation10 + $0x10] sm:$0xff]  ;;  %v517_v4 = vld [vmem:[#allocation10 + $0x18] sm:$0xff]  ;;  %v982_v16 = vmov 0.0   ;;  %s684_s1 = sshll.u32 %s983_s3, 4  ;;  %s685_s1 = int_to_ptr.vmem [resolvable:$true] %s684_s1 }
  0x51   :  { %807 = vpow2.f32 %v714_v10  ;;  %v518_v6 = vld [vmem:[#allocation10 + $0x20] sm:$0xff]  ;;  %v519_v7 = vld [vmem:[#allocation10 + $0x28] sm:$0xff]  ;;  %s933_s17 = scalar_lea.vmem %s685_s1, 1024  ;;  %p938_p5 = scmp.lt.s32.totalorder %s685_s1, %s685_s1 }
  0x52   :  { %809 = vpow2.f32 %v719_v14  ;;  %v532_v2 = vld [vmem:[#allocation2] sm:$0xff]  ;;  %p934_p4 = scmp.ne.s32.totalorder %s685_s1, %s933_s17  ;;  %p939_p6 = scmp.lt.s32.totalorder %s933_s17, %s933_s17 }
  0x53   :  { %811 = vpow2.f32 %v721_v15  ;;  %v1113_v8 = vmul.f32 %v532_v2, %v514_v0  ;;  %v1115_v9 = vmul.f32 %v532_v2, %v516_v1  ;;  %v1121_v14 = vmul.f32 %v532_v2, %v518_v6 }
  0x54   :  { %813 = vpow2.f32 %v720_v17  ;;  %p940_p7 = por %p939_p6, %p938_p5 }
  0x55   :  { %815 = vpow2.f32 %v722_v18  ;;  %v552_v18 = vmul.f32 %v1113_v8, %v1113_v8 }
  0x56   :  { %v533_v5 = vld [vmem:[#allocation2 + $0x8] sm:$0xff]  ;;  %p941_p8 = pnand %p940_p7, %p934_p4 }
  0x57   :  { %v1119_v11 = vmul.f32 %v533_v5, %v517_v4  ;;  %v1123_v15 = vmul.f32 %v533_v5, %v519_v7 }
  0x58   :  { %v802_v19 = vpop.eup %801 }
  0x59   :  { %v804_v20 = vpop.eup %803  ;;  %v100_v21 = vadd.f32 1.0, %v802_v19  ;;  %v554_v19 = vmul.f32 %v1115_v9, %v1115_v9 }
  0x5a   :  { %v806_v22 = vpop.eup %805  ;;  %v102_v23 = vadd.f32 1.0, %v804_v20 }
  0x5b   :  { %v808_v24 = vpop.eup %807  ;;  %817 = vrcp.f32 %v100_v21  ;;  %v101_v25 = vadd.f32 1.0, %v806_v22 }
  0x5c   :  { %v810_v26 = vpop.eup %809  ;;  %819 = vrcp.f32 %v102_v23  ;;  %v103_v27 = vadd.f32 1.0, %v808_v24  ;;  %v555_v23 = vmul.f32 %v1119_v11, %v1119_v11 }
  0x5d   :  { %v812_v28 = vpop.eup %811  ;;  %821 = vrcp.f32 %v101_v25  ;;  %v317_v29 = vadd.f32 1.0, %v810_v26 }
  0x5e   :  { %v814_v30 = vpop.eup %813  ;;  %823 = vrcp.f32 %v103_v27  ;;  %v319_v31 = vadd.f32 1.0, %v812_v28  ;;  %v520_v28 = vld [vmem:[#allocation10 + $0x30] sm:$0xff] }
  0x5f   :  { %v816_v32 = vpop.eup %815  ;;  %825 = vrcp.f32 %v317_v29  ;;  %v318_v33 = vadd.f32 1.0, %v814_v30  ;;  %v521_v29 = vld [vmem:[#allocation10 + $0x38] sm:$0xff]  ;;  %v556_v30 = vmul.f32 %v1121_v14, %v1121_v14 }
  0x60   :  { %827 = vrcp.f32 %v319_v31  ;;  %v320_v34 = vadd.f32 1.0, %v816_v32  ;;  %v557_v31 = vmul.f32 %v1123_v15, %v1123_v15 }
  0x61   :  { %829 = vrcp.f32 %v318_v33  ;;  %v569_v33 = vsel %vm112_vm0, %v552_v18, 0.0 }
  0x62   :  { %831 = vrcp.f32 %v320_v34  ;;  %v570_v34 = vsel %vm112_vm0, %v554_v19, 0.0 }
  0x65   :  { %v818_v35 = vpop.eup %817 }
  0x66   :  { %v820_v36 = vpop.eup %819  ;;  %v113_v37 = vsel %vm112_vm0, %v818_v35, -inf }
  0x67   :  { %v822_v38 = vpop.eup %821  ;;  %v114_v39 = vsel %vm112_vm0, %v820_v36, -inf }
  0x68   :  { %v824_v40 = vpop.eup %823  ;;  %v115_v41 = vmax.f32 %v113_v37, %v114_v39  ;;  %v116_v42 = vsel %vm112_vm0, %v822_v38, -inf  ;;  %v577_v38 = vsel %vm112_vm0, %v555_v23, 0.0 }
  0x69   :  { %v826_v43 = vpop.eup %825  ;;  %v117_v44 = vsel %vm112_vm0, %v824_v40, -inf  ;;  %v1147_v40 = vmul.f32 %v532_v2, %v520_v28 }
  0x6a   :  { %v828_v45 = vpop.eup %827  ;;  %747 = vmatprep.mubr.msk.f32.mxu0 %vm112_vm0, %v115_v41  ;;  %v118_v46 = vmax.f32 %v116_v42, %v117_v44  ;;  %v329_v47 = vsel %vm112_vm0, %v826_v43, -inf  ;;  %v1149_v41 = vmul.f32 %v533_v5, %v521_v29 }
  0x6b   :  { %v830_v48 = vpop.eup %829  ;;  %v330_v49 = vsel %vm112_vm0, %v828_v45, -inf  ;;  %v558_v43 = vmul.f32 %v1147_v40, %v1147_v40  ;;  %v571_v45 = vadd.f32 %v570_v34, %v569_v33 }
  0x6c   :  { %v832_v50 = vpop.eup %831  ;;  %748 = vmatmul.mubr.msk.f32.vlgmr.msra.gmra.mrb[0].mxu0 %vm112_vm0, %v118_v46  ;;  %v331_v51 = vmax.f32 %v329_v47, %v330_v49  ;;  %v332_v52 = vsel %vm112_vm0, %v830_v48, -inf  ;;  %v559_v44 = vmul.f32 %v1149_v41, %v1149_v41  ;;  %v522_v47 = vld [vmem:[#allocation10 + $0x40] sm:$0xff]  ;;  %v523_v48 = vld [vmem:[#allocation10 + $0x48] sm:$0xff]  ;;  %v572_v49 = vsel %vm112_vm0, %v556_v30, 0.0 }
  0x6d   :  { %782 = vmatpush3.bf16.msra.mxu0 %v1089_v3  ;;  %v333_v53 = vsel %vm112_vm0, %v832_v50, -inf  ;;  %v515_v3 = vld [vmem:[#allocation10 + $0x8] sm:$0xff]  ;;  %v579_v50 = vsel %vm112_vm0, %v557_v31, 0.0 }
  0x6e   :  { %761 = vmatprep.mubr.msk.f32.mxu0 %vm112_vm0, %v331_v51  ;;  %v334_v54 = vmax.f32 %v332_v52, %v333_v53  ;;  %v1117_v10 = vmul.f32 %v533_v5, %v515_v3  ;;  %v525_v51 = vld [vmem:[#allocation10 + $0x58] sm:$0xff]  ;;  %v527_v52 = vld [vmem:[#allocation10 + $0x68] sm:$0xff] }
  0x6f   :  { %v529_v53 = vld [vmem:[#allocation10 + $0x78] sm:$0xff] }
  0x70   :  { %762 = vmatmul.mubr.msk.f32.vlgmr.msra.gmra.mrb[2].mxu0 %vm112_vm0, %v334_v54  ;;  %v553_v22 = vmul.f32 %v1117_v10, %v1117_v10  ;;  %v524_v54 = vld [vmem:[#allocation10 + $0x50] sm:$0xff] }
  0x72   :  { %v576_v37 = vsel %vm112_vm0, %v553_v22, 0.0 }
  0x73   :  { %v578_v46 = vadd.f32 %v577_v38, %v576_v37 }
 0x13f   :  { %v749_v56 = vpop.f32.mrb[0].mxu0 }
 0x140   :  { %v191_v57 = vpop.f32.mrb[1].mxu0 }
 0x141   :  { %v775_v58 = vpack.c.bf16 %v749_v56, %v191_v57  ;;  %v528_v56 = vld [vmem:[#allocation10 + $0x70] sm:$0xff] }
 0x143   :  { %776 = vmatprep.subr.bf16.mxu1 %v775_v58  ;;  %v763_v59 = vpop.f32.mrb[2].mxu0 }
 0x144   :  { %778 = vmatpush3.bf16.msra.mxu1 %v775_v58  ;;  %v407_v60 = vpop.f32.mrb[3].mxu0  ;;  %v573_v58 = vadd.f32 %v572_v49, %v571_v45 }
 0x145   :  { %v783_v62 = vpack.c.bf16 %v763_v59, %v407_v60  ;;  %v574_v59 = vsel %vm112_vm0, %v558_v43, 0.0  ;;  %v580_v60 = vadd.f32 %v579_v50, %v578_v46 }
 0x146   :  { %v575_v19 = vadd.f32 %v574_v59, %v573_v58 }
 0x147   :  { %755 = vmatmul.mubr.msk.f32.vlgmr.msra.gmra.mrb[0].mxu1 %vm112_vm0, %v81_v61  ;;  %784 = vmatprep.subr.bf16.mxu1 %v783_v62 }
 0x148   :  { %786 = vmatpush3.bf16.msra.mxu1 %v783_v62  ;;  %768 = vmatprep.mubr.msk.f32.mxu1 %vm112_vm0, %v80_v55  ;;  %v526_v55 = vld [vmem:[#allocation10 + $0x60] sm:$0xff]  ;;  %v597_v33 = vmul.f32 0.5, %v575_v19 }
 0x14a   :  { %v601_v43 = vsel %vm112_vm0, %v597_v33, -inf }
 0x14b   :  { %769 = vmatmul.mubr.msk.f32.vlgmr.msra.gmra.mrb[2].mxu1 %vm112_vm0, %v81_v61  ;;  %v581_v61 = vsel %vm112_vm0, %v559_v44, 0.0 }
 0x21a   :  { %v756_v12 = vpop.f32.mrb[0].mxu1 }
 0x21b   :  { %vm282_vm1 = vcmp.gt.f32.partialorder %v756_v12, 0.3  ;;  %v272_v13 = vpop.f32.mrb[1].mxu1 }
 0x21c   :  { %v284_v17 = vsel %vm282_vm1, 1.0, %v982_v16  ;;  %vm281_vm2 = vcmp.gt.f32.partialorder %v272_v13, 0.3 }
 0x21d   :  { %v283_v20 = vsel %vm281_vm2, 1.0, %v982_v16  ;;  %v286_v21 = vsel %vm112_vm0, %v284_v17, 0.0 }
 0x21e   :  { %v770_v24 = vpop.f32.mrb[2].mxu1  ;;  %v285_v25 = vsel %vm112_vm0, %v283_v20, 0.0  ;;  %v582_v20 = vadd.f32 %v581_v61, %v580_v60 }
 0x21f   :  { %vm492_vm3 = vcmp.gt.f32.partialorder %v770_v24, 0.3  ;;  %v482_v26 = vpop.f32.mrb[3].mxu1  ;;  %v287_v27 = vadd.f32 %v286_v21, %v285_v25 }
 0x220   :  { %v494_v32 = vsel %vm492_vm3, 1.0, %v982_v16  ;;  %vm491_vm4 = vcmp.gt.f32.partialorder %v482_v26, 0.3  ;;  %v598_v34 = vmul.f32 0.5, %v582_v20 }
 0x221   :  { %510 = vst.msk [vmem:[#allocation2 + $0x18] sm:$0xff] %vm112_vm0, %v494_v32  ;;  %v493_v35 = vsel %vm491_vm4, 1.0, %v982_v16  ;;  %288 = vadd.xlane.f32.xlu0 %v287_v27  ;;  %v496_v36 = vsel %vm112_vm0, %v494_v32, 0.0 }
 0x222   :  { %v495_v39 = vsel %vm112_vm0, %v493_v35, 0.0  ;;  %509 = vst.msk [vmem:[#allocation2 + $0x10] sm:$0xff] %vm112_vm0, %v493_v35  ;;  %v604_v44 = vsel %vm112_vm0, %v598_v34, -inf }
 0x223   :  { %v497_v42 = vadd.f32 %v496_v36, %v495_v39 }
 0x225   :  { %498 = vadd.xlane.f32.xlu0 %v497_v42 }
 0x228   :  { %v535_v57 = vld [vmem:[#allocation2 + $0x18] sm:$0xff] }
 0x229   :  { %v534_v62 = vld [vmem:[#allocation2 + $0x10] sm:$0xff]  ;;  %v1159_v63 = vmul.f32 %v535_v57, %v523_v48  ;;  %v1161_v0 = vmul.f32 %v535_v57, %v525_v51  ;;  %v1163_v1 = vmul.f32 %v535_v57, %v527_v52  ;;  %v1165_v2 = vmul.f32 %v535_v57, %v529_v53 }
 0x22a   :  { %v1167_v3 = vmul.f32 %v534_v62, %v522_v47  ;;  %v1169_v4 = vmul.f32 %v534_v62, %v524_v54  ;;  %v1171_v5 = vmul.f32 %v534_v62, %v526_v55  ;;  %v1173_v6 = vmul.f32 %v534_v62, %v528_v56 }
 0x22b   :  { %v561_v7 = vmul.f32 %v1159_v63, %v1117_v10  ;;  %v563_v12 = vmul.f32 %v1161_v0, %v1119_v11  ;;  %v565_v18 = vmul.f32 %v1163_v1, %v1123_v15  ;;  %v567_v24 = vmul.f32 %v1165_v2, %v1149_v41 }
 0x22c   :  { %v560_v13 = vmul.f32 %v1167_v3, %v1113_v8  ;;  %v562_v16 = vmul.f32 %v1169_v4, %v1115_v9  ;;  %v564_v17 = vmul.f32 %v1171_v5, %v1121_v14  ;;  %v566_v23 = vmul.f32 %v1173_v6, %v1147_v40 }
 0x22d   :  { %v590_v21 = vsel %vm112_vm0, %v561_v7, 0.0  ;;  %v591_v22 = vsel %vm112_vm0, %v563_v12, 0.0  ;;  %v593_v30 = vsel %vm112_vm0, %v565_v18, 0.0  ;;  %v595_v36 = vsel %vm112_vm0, %v567_v24, 0.0 }
 0x22e   :  { %v583_v25 = vsel %vm112_vm0, %v560_v13, 0.0  ;;  %v584_v26 = vsel %vm112_vm0, %v562_v16, 0.0  ;;  %v592_v28 = vadd.f32 %v591_v22, %v590_v21  ;;  %v586_v29 = vsel %vm112_vm0, %v564_v17, 0.0 }
 0x22f   :  { %v585_v27 = vadd.f32 %v584_v26, %v583_v25  ;;  %v588_v35 = vsel %vm112_vm0, %v566_v23, 0.0 }
 0x230   :  { %v594_v32 = vadd.f32 %v593_v30, %v592_v28 }
 0x231   :  { %v587_v31 = vadd.f32 %v586_v29, %v585_v27 }
 0x232   :  { %v596_v38 = vadd.f32 %v595_v36, %v594_v32 }
 0x233   :  { %v589_v37 = vadd.f32 %v588_v35, %v587_v31 }
 0x234   :  { %v600_v42 = vmul.f32 0.5, %v596_v38 }
 0x235   :  { %v599_v39 = vmul.f32 0.5, %v589_v37 }
 0x236   :  { %v605_v46 = vsel %vm112_vm0, %v600_v42, -inf }
 0x237   :  { %v602_v45 = vsel %vm112_vm0, %v599_v39, -inf  ;;  %v606_v48 = vmax.f32 %v604_v44, %v605_v46 }
 0x238   :  { %v603_v47 = vmax.f32 %v601_v43, %v602_v45 }
 0x239   :  { %v608_v50 = vsub.f32 %v598_v34, %v606_v48  ;;  %v610_v52 = vsub.f32 %v600_v42, %v606_v48 }
 0x23a   :  { %v607_v49 = vsub.f32 %v597_v33, %v603_v47  ;;  %v609_v51 = vsub.f32 %v599_v39, %v603_v47 }
 0x23b   :  { %v613_v54 = vmul.f32 1.442695, %v608_v50  ;;  %v617_v56 = vmul.f32 1.442695, %v610_v52 }
 0x23c   :  { %v611_v53 = vmul.f32 1.442695, %v607_v49  ;;  %v615_v55 = vmul.f32 1.442695, %v609_v51 }
 0x23e   :  { %833 = vpow2.f32 %v611_v53 }
 0x23f   :  { %835 = vpow2.f32 %v613_v54 }
 0x240   :  { %837 = vpow2.f32 %v615_v55 }
 0x241   :  { %839 = vpow2.f32 %v617_v56 }
 0x248   :  { %v834_v57 = vpop.eup %833 }
 0x249   :  { %v836_v58 = vpop.eup %835  ;;  %v619_v59 = vsel %vm112_vm0, %v834_v57, 0.0 }
 0x24a   :  { %v838_v60 = vpop.eup %837  ;;  %v622_v61 = vsel %vm112_vm0, %v836_v58, 0.0 }
 0x24b   :  { %v840_v62 = vpop.eup %839  ;;  %v620_v7 = vsel %vm112_vm0, %v838_v60, 0.0 }
 0x24c   :  { %v621_v12 = vadd.f32 %v620_v7, %v619_v59  ;;  %v623_v13 = vsel %vm112_vm0, %v840_v62, 0.0 }
 0x24d   :  { %v624_v16 = vadd.f32 %v623_v13, %v622_v61 }
 0x24e   :  { %841 = vrcp.f32 %v621_v12 }
 0x24f   :  { %843 = vrcp.f32 %v624_v16 }
 0x258   :  { %v842_v17 = vpop.eup %841 }
 0x259   :  { %v844_v18 = vpop.eup %843  ;;  %v627_v19 = vmul.f32 %v842_v17, %v834_v57  ;;  %v629_v20 = vmul.f32 %v842_v17, %v838_v60 }
 0x25a   :  { %v628_v21 = vmul.f32 %v844_v18, %v836_v58  ;;  %v630_v22 = vmul.f32 %v844_v18, %v840_v62 }
 0x25b   :  { %v631_v23 = vmul.f32 %v627_v19, %v1113_v8  ;;  %v633_v24 = vmul.f32 %v627_v19, %v1115_v9  ;;  %v635_v25 = vmul.f32 %v627_v19, %v1121_v14  ;;  %v637_v26 = vmul.f32 %v627_v19, %v1147_v40 }
 0x25c   :  { %v632_v27 = vmul.f32 %v628_v21, %v1117_v10  ;;  %v634_v28 = vmul.f32 %v628_v21, %v1119_v11  ;;  %v636_v29 = vmul.f32 %v628_v21, %v1123_v15  ;;  %v638_v30 = vmul.f32 %v628_v21, %v1149_v41 }
 0x25d   :  { %v639_v31 = vmul.f32 %v629_v20, %v1167_v3  ;;  %v640_v32 = vmul.f32 %v630_v22, %v1159_v63  ;;  %v641_v8 = vmul.f32 %v629_v20, %v1169_v4  ;;  %v642_v9 = vmul.f32 %v630_v22, %v1161_v0 }
 0x25e   :  { %v643_v14 = vmul.f32 %v629_v20, %v1171_v5  ;;  %v644_v40 = vmul.f32 %v630_v22, %v1163_v1  ;;  %v645_v10 = vmul.f32 %v629_v20, %v1173_v6  ;;  %v646_v11 = vmul.f32 %v630_v22, %v1165_v2 }
 0x25f   :  { %v647_v15 = vsel %vm112_vm0, %v631_v23, 0.0  ;;  %v648_v41 = vsel %vm112_vm0, %v639_v31, 0.0  ;;  %v650_v3 = vsel %vm112_vm0, %v632_v27, 0.0  ;;  %v651_v63 = vsel %vm112_vm0, %v640_v32, 0.0 }
 0x260   :  { %v649_v33 = vadd.f32 %v648_v41, %v647_v15  ;;  %v652_v4 = vadd.f32 %v651_v63, %v650_v3  ;;  %v653_v0 = vsel %vm112_vm0, %v633_v24, 0.0  ;;  %v654_v5 = vsel %vm112_vm0, %v641_v8, 0.0 }
 0x261   :  { %v655_v34 = vadd.f32 %v654_v5, %v653_v0  ;;  %v656_v1 = vsel %vm112_vm0, %v634_v28, 0.0  ;;  %v657_v6 = vsel %vm112_vm0, %v642_v9, 0.0  ;;  %v659_v2 = vsel %vm112_vm0, %v635_v25, 0.0 }
 0x262   :  { %v658_v35 = vadd.f32 %v657_v6, %v656_v1  ;;  %v660_v36 = vsel %vm112_vm0, %v643_v14, 0.0  ;;  %v662_v37 = vsel %vm112_vm0, %v636_v29, 0.0  ;;  %v663_v38 = vsel %vm112_vm0, %v644_v40, 0.0  ;;  %671 = vst.msk [vmem:[#allocation12] sm:$0xff] %vm112_vm0, %v649_v33  ;;  %672 = vst.msk [vmem:[#allocation12 + $0x8] sm:$0xff] %vm112_vm0, %v652_v4 }
 0x263   :  { %v661_v39 = vadd.f32 %v660_v36, %v659_v2  ;;  %v664_v42 = vadd.f32 %v663_v38, %v662_v37  ;;  %v665_v43 = vsel %vm112_vm0, %v637_v26, 0.0  ;;  %v666_v44 = vsel %vm112_vm0, %v645_v10, 0.0  ;;  %673 = vst.msk [vmem:[#allocation12 + $0x10] sm:$0xff] %vm112_vm0, %v655_v34 }
 0x264   :  { %v667_v45 = vadd.f32 %v666_v44, %v665_v43  ;;  %v668_v46 = vsel %vm112_vm0, %v638_v30, 0.0  ;;  %v669_v47 = vsel %vm112_vm0, %v646_v11, 0.0  ;;  %674 = vst.msk [vmem:[#allocation12 + $0x18] sm:$0xff] %vm112_vm0, %v658_v35 }
 0x265   :  { %v670_v48 = vadd.f32 %v669_v47, %v668_v46  ;;  %675 = vst.msk [vmem:[#allocation12 + $0x20] sm:$0xff] %vm112_vm0, %v661_v39  ;;  %676 = vst.msk [vmem:[#allocation12 + $0x28] sm:$0xff] %vm112_vm0, %v664_v42 }
 0x266   :  { %677 = vst.msk [vmem:[#allocation12 + $0x30] sm:$0xff] %vm112_vm0, %v667_v45 }
 0x267   :  { %678 = vst.msk [vmem:[#allocation12 + $0x38] sm:$0xff] %vm112_vm0, %v670_v48 }
 0x268   :  { %944 = shalt.err (!%p941_p8)
}
 0x269   :  { %s945_s20 = scalar_lea.hbm %s1278_s4, 1024 }
 0x26a   :  { %p946_p9 = scmp.ne.s32.totalorder %s1278_s4, %s945_s20  ;;  %p949_p10 = scmp.lt.u32.totalorder %s945_s20, %s1278_s4 }
 0x26c   :  { %p951_p11 = pnand %p949_p10, %p946_p9 }
 0x26e   :  { %954 = shalt.err (!%p951_p11)
}
 0x26f   :  { %690 = dma.vmem_to_hbm [thread:$0]  %s685_s1, 1024, %s1278_s4, [#allocation5], %s977_s30, %s977_s30, %s978_s6  }
 0x270   :  { %s955_s21 = scalar_lea.hbm %s1279_s5, 16 }
 0x271   :  { %p956_p12 = scmp.ne.s32.totalorder %s1279_s5, %s955_s21  ;;  %p959_p13 = scmp.lt.u32.totalorder %s955_s21, %s1279_s5 }
 0x273   :  { %p961_p0 = pnand %p959_p13, %p956_p12 }
 0x2ae   :  { %v289_v49 = vpop.xlane.xlu0 %288 }
 0x2af   :  { %v290_v50 = vrot.slane %v289_v49, 4 }
 0x2b1   :  { %v291_v51 = vadd.f32 %v290_v50, %v289_v49 }
 0x2b2   :  { %v499_v52 = vpop.xlane.xlu0 %498 }
 0x2b3   :  { %v292_v53 = vrot.slane %v291_v51, 2  ;;  %v500_v54 = vrot.slane %v499_v52, 4 }
 0x2b5   :  { %v501_v55 = vadd.f32 %v500_v54, %v499_v52  ;;  %v293_v56 = vadd.f32 %v292_v53, %v291_v51 }
 0x2b7   :  { %v502_v57 = vrot.slane %v501_v55, 2  ;;  %v294_v58 = vrot.slane %v293_v56, 1 }
 0x2b9   :  { %v503_v59 = vadd.f32 %v502_v57, %v501_v55  ;;  %v295_v60 = vadd.f32 %v294_v58, %v293_v56 }
 0x2bb   :  { %787 = vpush %v295_v60  ;;  %v504_v61 = vrot.slane %v503_v59, 1 }
 0x2bd   :  { %v505_v62 = vadd.f32 %v504_v61, %v503_v59 }
 0x2bf   :  { %789 = vpush %v505_v62 }
 0x2ec   :  { %s788_s28 = spop %787 }
 0x2f0   :  { %s790_s29 = spop %789 }
 0x2f1   :  { %s507_s0 = sadd.f32 %s790_s29, %s788_s28 }
 0x2f3   :  { %s511_s4 = smul.f32 0.001953125, %s507_s0 }
 0x2f5   :  { %513 = sst [smem:[#allocation13]] %s511_s4 }
 0x2f6   :  { %964 = shalt.err (!%p961_p0)
}
 0x2f7   :  { %s984_s11 = smov [#allocation13]  }
 0x2f8   :  { %698 = dma.smem_to_hbm %s984_s11, 16, %s1279_s5, [#allocation6]  }
 0x2f9   :  { %971 = dma.done.wait [#allocation5], 1024  }
 0x2fa   :  { %972 = vsyncadd [#allocation5], 4294966272 }
 0x2fb   :  { %973 = dma.done.wait [#allocation6], 16  }
 0x2fc   :  { %974 = vsyncadd [#allocation6], 4294967280 }
 0x2fd   :  { %705 = sfence }
 0x2fe   :  { %706 = vsyncpa [#allocation4], 1 }
 0x2ff   :  { %707 = vsyncpa [#allocation8], 1 }
 0x300   :  { %708 = vsyncpa [#allocation11], 1 }
 0x301   :  { %709 = vsyncpa [#allocation5], 1 }
 0x302   :  { %710 = vsyncpa [#allocation6], 1 }

</bundles_post_ra>
